<compile_context>
chip_gen: v5e
topology: v5e:2x2
jax: 0.10.0
libtpu: 0.0.40
codegen_flags: <defaults>
</compile_context>

<pallas_src>
import functools

import jax
import jax.numpy as jnp
from jax import lax
from jax.experimental import pallas as pl
from jax.experimental.pallas import tpu as pltpu


def _round_up(x, m):
    return ((x + m - 1) // m) * m


# ----------------------------------------------------------------------------
# RBF kernel: one (T, T) tile of the pairwise matrix per grid step.
# Only upper-triangle tiles (j >= i) are computed; off-diagonal tiles count x2.
# ----------------------------------------------------------------------------
def _mmd_rbf_tile_kernel(coef_ref, rows_ref, cols_ref, nr_ref, nc_ref,
                         sr_ref, sc_ref, out_ref, *, kernel_num, use_squaring):
    i = pl.program_id(0)
    j = pl.program_id(1)

    # Zero the resident per-row-tile accumulator at the start of the j sweep.
    @pl.when(j == 0)
    def _():
        out_ref[...] = jnp.zeros_like(out_ref)

    # Symmetry: K_ij == K_ji and s_i*s_j is symmetric -> skip lower triangle.
    @pl.when(j >= i)
    def _():
        # Gram tile on the MXU with f32 accumulation (inputs f32 or bf16).
        gram = lax.dot_general(
            rows_ref[...], cols_ref[...],
            dimension_numbers=(((1,), (1,)), ((), ())),
            preferred_element_type=jnp.float32)                   # [T, T]

        # Pairwise squared distances from precomputed row norms (fed in both
        # the [T,1] and [1,T] layouts -> no per-tile transpose).  Clamp tiny
        # negatives from cancellation so exp(-l2/bw) <= 1 like the reference.
        l2 = jnp.maximum(nr_ref[...] + nc_ref[...] - 2.0 * gram, 0.0)

        # Multi-bandwidth RBF sum.  coef[q] = -1 / (bandwidth * kernel_mul**q).
        if use_squaring:
            # kernel_mul == 2: 1 exp + repeated squaring,
            # exp(-l2/bw_q) = E ** 2**(kernel_num-1-q),  E = exp(-l2/bw_max).
            e = jnp.exp(l2 * coef_ref[kernel_num - 1])
            ksum = e
            cur = e
            for _ in range(kernel_num - 1):
                cur = cur * cur
                ksum = ksum + cur
        else:
            ksum = jnp.exp(l2 * coef_ref[0])
            for q in range(1, kernel_num):
                ksum = ksum + jnp.exp(l2 * coef_ref[q])

        # Signed column reduction on the (otherwise idle) MXU: [T,T] x [T,1].
        col_red = jnp.dot(ksum, sc_ref[...],
                          preferred_element_type=jnp.float32)     # [T, 1]

        # Diagonal tiles counted once, off-diagonal tiles twice.
        scale = jnp.where(i == j, 1.0, 2.0).astype(jnp.float32)
        out_ref[...] += scale * sr_ref[...] * col_red


def mmd_loss_rbf(source, target, kernel_mul=2.0, kernel_num=5, fix_sigma=None,
                 use_bf16_matmul=True, tile=None):
    """MMDLoss(kernel_type='rbf').forward(source, target)."""
    assert source.ndim == 2 and source.shape == target.shape
    b, d = source.shape
    n = 2 * b
    total = jnp.concatenate(
        [source.astype(jnp.float32), target.astype(jnp.float32)], axis=0)

    # Center the data: pairwise distances are translation invariant; this
    # removes cancellation in the analytic bandwidth and in nr + nc - 2*gram,
    # and makes the bf16 gram default numerically safe.
    total_c = total - jnp.mean(total, axis=0, keepdims=True)

    # O(N*D) pre-pass: row norms (reused in the kernel) + analytic bandwidth.
    sq_norms = jnp.sum(total_c * total_c, axis=1)                 # [N]
    if fix_sigma:
        bandwidth = jnp.asarray(fix_sigma, jnp.float32)
    else:
        col_sum = jnp.sum(total_c, axis=0)                        # [D], ~0
        sum_l2 = 2.0 * n * jnp.sum(sq_norms) - 2.0 * jnp.sum(col_sum * col_sum)
        bandwidth = sum_l2 / jnp.float32(n * n - n)
    bandwidth = bandwidth / (kernel_mul ** (kernel_num // 2))
    coef = jnp.stack(
        [-1.0 / (bandwidth * (kernel_mul ** q)) for q in range(kernel_num)]
    ).astype(jnp.float32)                                         # [kernel_num]

    mat_bytes = 2 if use_bf16_matmul else 4

    # Tile choice: single tile for small N; otherwise the biggest square tile
    # (<=512, a v7x-safe cap) whose double-buffered row+col input tiles fit a
    # conservative VMEM budget.  Multi-tile case keeps >=2 row tiles so the
    # "parallel" axis feeds both v7x TensorCores.
    if tile is not None:
        t = int(tile)
        n_pad = _round_up(n, t)
    elif n <= 512:
        t = _round_up(max(n, 8), 8)
        n_pad = t
    else:
        input_budget = 28 * 1024 * 1024
        t = 128
        for cand in (512, 256, 128):
            if 4 * cand * d * mat_bytes <= input_budget:          # 2 inputs x 2 bufs
                t = cand
                break
        n_pad = _round_up(n, t)

    # Skip the padded copy (a full extra HBM round-trip) when n divides t.
    if n_pad == n:
        total_p = total_c
        sqp = sq_norms
    else:
        total_p = jnp.zeros((n_pad, d), jnp.float32).at[:n, :].set(total_c)
        sqp = jnp.zeros((n_pad,), jnp.float32).at[:n].set(sq_norms)
    norms_r = sqp.reshape(n_pad, 1)
    norms_c = sqp.reshape(1, n_pad)

    # Precomputed signs: +1 source, -1 target, 0 padding.
    idx = jnp.arange(n_pad)
    signs = jnp.where(idx < b, 1.0,
                      jnp.where(idx < n, -1.0, 0.0)).astype(jnp.float32)
    signs = signs.reshape(n_pad, 1)

    mat = total_p.astype(jnp.bfloat16) if use_bf16_matmul else total_p

    grid = (n_pad // t, n_pad // t)
    use_squaring = abs(float(kernel_mul) - 2.0) < 1e-9 and kernel_num >= 1
    kernel = functools.partial(
        _mmd_rbf_tile_kernel, kernel_num=int(kernel_num),
        use_squaring=use_squaring)

    partials = pl.pallas_call(
        kernel,
        out_shape=jax.ShapeDtypeStruct((n_pad, 1), jnp.float32),
        grid=grid,
        in_specs=[
            pl.BlockSpec(memory_space=pltpu.MemorySpace.SMEM),    # coef scalars
            pl.BlockSpec((t, d), lambda i, j: (i, 0)),            # row tiles
            pl.BlockSpec((t, d), lambda i, j: (j, 0)),            # col tiles
            pl.BlockSpec((t, 1), lambda i, j: (i, 0)),            # row norms
            pl.BlockSpec((1, t), lambda i, j: (0, j)),            # col norms
            pl.BlockSpec((t, 1), lambda i, j: (i, 0)),            # row signs
            pl.BlockSpec((t, 1), lambda i, j: (j, 0)),            # col signs
        ],
        out_specs=pl.BlockSpec((t, 1), lambda i, j: (i, 0)),
        compiler_params=pltpu.CompilerParams(
            dimension_semantics=("parallel", "arbitrary"),
            vmem_limit_bytes=48 * 1024 * 1024),
    )(coef, mat, mat, norms_r, norms_c, signs, signs)

    # Tiny final reduction of the per-row-tile partial sums.
    return jnp.sum(partials) / jnp.float32(b * b)


# ----------------------------------------------------------------------------
# Linear MMD (kernel_type='linear'): row-tiled column-sum accumulation, then
# a tiny O(D) finish in the wrapper.
# ----------------------------------------------------------------------------
def _mmd_linear_sum_kernel(src_ref, tgt_ref, acc_ref):
    @pl.when(pl.program_id(0) == 0)
    def _():
        acc_ref[...] = jnp.zeros_like(acc_ref)
    acc_ref[...] += jnp.sum(src_ref[...] - tgt_ref[...], axis=0, keepdims=True)


def mmd_loss_linear(source, target, row_tile=512):
    assert source.ndim == 2 and source.shape == target.shape
    b, d = source.shape
    src = source.astype(jnp.float32)
    tgt = target.astype(jnp.float32)

    if b <= row_tile:
        tr, b_pad = b, b
    else:
        tr = row_tile
        b_pad = _round_up(b, tr)
        if b_pad != b:   # zero-padded rows contribute 0 to the difference sum
            src = jnp.zeros((b_pad, d), jnp.float32).at[:b, :].set(src)
            tgt = jnp.zeros((b_pad, d), jnp.float32).at[:b, :].set(tgt)

    col_sum = pl.pallas_call(
        _mmd_linear_sum_kernel,
        out_shape=jax.ShapeDtypeStruct((1, d), jnp.float32),
        grid=(b_pad // tr,),
        in_specs=[pl.BlockSpec((tr, d), lambda i: (i, 0)),
                  pl.BlockSpec((tr, d), lambda i: (i, 0))],
        out_specs=pl.BlockSpec((1, d), lambda i: (0, 0)),
        compiler_params=pltpu.CompilerParams(
            dimension_semantics=("arbitrary",)),
    )(src, tgt)

    delta = col_sum / jnp.float32(b)
    return jnp.sum(delta * delta)


def mmd_loss(source, target, kernel_type="rbf", kernel_mul=2.0, kernel_num=5,
             fix_sigma=None):
    if kernel_type == "linear":
        return mmd_loss_linear(source, target)
    return mmd_loss_rbf(source, target, kernel_mul=kernel_mul,
                        kernel_num=kernel_num, fix_sigma=fix_sigma)


# ----------------------------------------------------------------------------
# Pure-JAX references (mirror the PyTorch module) for sanity checks.
# ----------------------------------------------------------------------------
def _mmd_loss_rbf_ref(source, target, kernel_mul=2.0, kernel_num=5):
    b = source.shape[0]
    total = jnp.concatenate([source, target], axis=0).astype(jnp.float32)
    n = total.shape[0]
    diff = total[None, :, :] - total[:, None, :]
    l2 = jnp.sum(diff * diff, axis=2)
    bandwidth = jnp.sum(l2) / (n * n - n)
    bandwidth = bandwidth / (kernel_mul ** (kernel_num // 2))
    kernels = sum(jnp.exp(-l2 / (bandwidth * kernel_mul ** i))
                  for i in range(kernel_num))
    xx = jnp.mean(kernels[:b, :b])
    yy = jnp.mean(kernels[b:, b:])
    xy = jnp.mean(kernels[:b, b:])
    yx = jnp.mean(kernels[b:, :b])
    return xx + yy - xy - yx


def _mmd_loss_linear_ref(source, target):
    delta = jnp.mean(source, axis=0) - jnp.mean(target, axis=0)
    return jnp.dot(delta, delta)


if __name__ == "__main__":
    key = jax.random.PRNGKey(0)
    k_src, k_tgt, k_src2, k_tgt2 = jax.random.split(key, 4)

    # Small case: single tile, no padding (n = 16 divides the tile).
    B, D = 8, 32
    source = jax.random.normal(k_src, (B, D), dtype=jnp.float32)
    target = jax.random.normal(k_tgt, (B, D), dtype=jnp.float32) + 0.5

    ref = jax.block_until_ready(_mmd_loss_rbf_ref(source, target))
    loss_f32 = jax.block_until_ready(
        mmd_loss_rbf(source, target, use_bf16_matmul=False))
    assert jnp.allclose(loss_f32, ref, rtol=1e-3, atol=1e-5), (loss_f32, ref)
    loss_bf16 = jax.block_until_ready(mmd_loss_rbf(source, target))
    assert jnp.allclose(loss_bf16, ref, rtol=5e-2, atol=1e-3), (loss_bf16, ref)

    lin = jax.block_until_ready(mmd_loss_linear(source, target))
    lin_ref = jax.block_until_ready(_mmd_loss_linear_ref(source, target))
    assert jnp.allclose(lin, lin_ref, rtol=1e-4, atol=1e-5), (lin, lin_ref)

    # Larger case: explicit tile=128 exercises the multi-tile grid, the
    # upper-triangle symmetry skip, zero-sign padding, and the tiled linear
    # path (row_tile=64).
    B2, D2 = 160, 48
    source2 = jax.random.normal(k_src2, (B2, D2), dtype=jnp.float32)
    target2 = jax.random.normal(k_tgt2, (B2, D2), dtype=jnp.float32) + 0.3

    ref2 = jax.block_until_ready(_mmd_loss_rbf_ref(source2, target2))
    loss2_f32 = jax.block_until_ready(
        mmd_loss_rbf(source2, target2, use_bf16_matmul=False, tile=128))
    assert jnp.allclose(loss2_f32, ref2, rtol=1e-3, atol=1e-5), (loss2_f32, ref2)
    loss2_bf16 = jax.block_until_ready(mmd_loss_rbf(source2, target2, tile=128))
    assert jnp.allclose(loss2_bf16, ref2, rtol=5e-2, atol=1e-3), (loss2_bf16, ref2)

    lin2 = jax.block_until_ready(mmd_loss_linear(source2, target2, row_tile=64))
    lin2_ref = jax.block_until_ready(_mmd_loss_linear_ref(source2, target2))
    assert jnp.allclose(lin2, lin2_ref, rtol=1e-4, atol=1e-5), (lin2, lin2_ref)

    print("KERNEL_OK")
</pallas_src>

<mosaic_0001>
module attributes {stable_mosaic.version = 11 : i64} {
  func.func @_mmd_rbf_tile_kernel(%arg0: i32, %arg1: i32, %arg2: memref<5xf32, #tpu.memory_space<smem>>, %arg3: memref<16x32xf32, #tpu.memory_space<vmem>>, %arg4: memref<16x32xf32, #tpu.memory_space<vmem>>, %arg5: memref<16x1xf32, #tpu.memory_space<vmem>>, %arg6: memref<1x16xf32, #tpu.memory_space<vmem>>, %arg7: memref<16x1xf32, #tpu.memory_space<vmem>>, %arg8: memref<16x1xf32, #tpu.memory_space<vmem>>, %arg9: memref<16x1xf32, #tpu.memory_space<vmem>>) attributes {dimension_semantics = [#tpu.dimension_semantics<parallel>, #tpu.dimension_semantics<arbitrary>], iteration_bounds = array<i64: 1, 1>, scalar_prefetch = 0 : i64, scratch_operands = 0 : i64, tpu.core_type = #tpu.core_type<tc>, window_params = [{transform_indices = @transform_0, window_bounds = array<i64: 5>}, {transform_indices = @transform_1, window_bounds = array<i64: 16, 32>}, {transform_indices = @transform_2, window_bounds = array<i64: 16, 32>}, {transform_indices = @transform_3, window_bounds = array<i64: 16, 1>}, {transform_indices = @transform_4, window_bounds = array<i64: 1, 16>}, {transform_indices = @transform_5, window_bounds = array<i64: 16, 1>}, {transform_indices = @transform_6, window_bounds = array<i64: 16, 1>}, {transform_indices = @transform_7, window_bounds = array<i64: 16, 1>}]} {
    %c0_i32 = arith.constant 0 : i32
    %0 = arith.cmpi eq, %arg1, %c0_i32 : i32
    %1 = arith.extui %0 : i1 to i32
    %c0_i32_0 = arith.constant 0 : i32
    %2 = arith.cmpi ne, %1, %c0_i32_0 : i32
    scf.if %2 {
      %cst = arith.constant 0.000000e+00 : f32
      %6 = vector.broadcast %cst : f32 to vector<16x1xf32>
      %c0 = arith.constant 0 : index
      %c0_2 = arith.constant 0 : index
      %7 = vector.load %arg9[%c0, %c0_2] : memref<16x1xf32, #tpu.memory_space<vmem>>, vector<16x1xf32>
      tpu.vector_store %arg9[%c0, %c0_2], %6 {strides = array<i32>} : memref<16x1xf32, #tpu.memory_space<vmem>>, vector<16x1xf32>,
    } else {
    }
    %3 = arith.cmpi sge, %arg1, %arg0 : i32
    %4 = arith.extui %3 : i1 to i32
    %c0_i32_1 = arith.constant 0 : i32
    %5 = arith.cmpi ne, %4, %c0_i32_1 : i32
    scf.if %5 {
      %c0 = arith.constant 0 : index
      %c0_2 = arith.constant 0 : index
      %6 = vector.load %arg3[%c0, %c0_2] : memref<16x32xf32, #tpu.memory_space<vmem>>, vector<16x32xf32>
      %c0_3 = arith.constant 0 : index
      %c0_4 = arith.constant 0 : index
      %7 = vector.load %arg4[%c0_3, %c0_4] : memref<16x32xf32, #tpu.memory_space<vmem>>, vector<16x32xf32>
      %cst = arith.constant dense<0.000000e+00> : vector<16x16xf32>
      %8 = tpu.matmul %6, %7, %cst {dimension_numbers = #tpu.dot_dimension_numbers<[1], [1], [0], [0], [0, 0, 1, 0], [], []>} : vector<16x32xf32>, vector<16x32xf32>, vector<16x16xf32> -> vector<16x16xf32>
      %c0_5 = arith.constant 0 : index
      %c0_6 = arith.constant 0 : index
      %9 = vector.load %arg5[%c0_5, %c0_6] : memref<16x1xf32, #tpu.memory_space<vmem>>, vector<16x1xf32>
      %c0_7 = arith.constant 0 : index
      %c0_8 = arith.constant 0 : index
      %10 = vector.load %arg6[%c0_7, %c0_8] : memref<1x16xf32, #tpu.memory_space<vmem>>, vector<1x16xf32>
      %11 = vector.broadcast %9 : vector<16x1xf32> to vector<16x16xf32>
      %12 = vector.broadcast %10 : vector<1x16xf32> to vector<16x16xf32>
      %13 = arith.addf %11, %12 : vector<16x16xf32>
      %cst_9 = arith.constant 2.000000e+00 : f32
      %14 = vector.broadcast %cst_9 : f32 to vector<16x16xf32>
      %15 = arith.mulf %14, %8 : vector<16x16xf32>
      %16 = arith.subf %13, %15 : vector<16x16xf32>
      %cst_10 = arith.constant 0.000000e+00 : f32
      %17 = vector.broadcast %cst_10 : f32 to vector<16x16xf32>
      %18 = arith.maximumf %16, %17 : vector<16x16xf32>
      %c4 = arith.constant 4 : index
      %19 = memref.load %arg2[%c4] : memref<5xf32, #tpu.memory_space<smem>>
      %20 = vector.broadcast %19 : f32 to vector<16x16xf32>
      %21 = arith.mulf %18, %20 : vector<16x16xf32>
      %22 = math.exp %21 : vector<16x16xf32>
      %23 = arith.mulf %22, %22 : vector<16x16xf32>
      %24 = arith.addf %22, %23 : vector<16x16xf32>
      %25 = arith.mulf %23, %23 : vector<16x16xf32>
      %26 = arith.addf %24, %25 : vector<16x16xf32>
      %27 = arith.mulf %25, %25 : vector<16x16xf32>
      %28 = arith.addf %26, %27 : vector<16x16xf32>
      %29 = arith.mulf %27, %27 : vector<16x16xf32>
      %30 = arith.addf %28, %29 : vector<16x16xf32>
      %c0_11 = arith.constant 0 : index
      %c0_12 = arith.constant 0 : index
      %31 = vector.load %arg8[%c0_11, %c0_12] : memref<16x1xf32, #tpu.memory_space<vmem>>, vector<16x1xf32>
      %cst_13 = arith.constant dense<0.000000e+00> : vector<16x1xf32>
      %32 = tpu.matmul %30, %31, %cst_13 {dimension_numbers = #tpu.dot_dimension_numbers<[1], [0], [0], [1], [0, 0, 1, 1], [], []>} : vector<16x16xf32>, vector<16x1xf32>, vector<16x1xf32> -> vector<16x1xf32>
      %33 = arith.cmpi eq, %arg0, %arg1 : i32
      %cst_14 = arith.constant 1.000000e+00 : f32
      %cst_15 = arith.constant 2.000000e+00 : f32
      %34 = arith.select %33, %cst_14, %cst_15 : f32
      %c0_16 = arith.constant 0 : index
      %c0_17 = arith.constant 0 : index
      %35 = vector.load %arg9[%c0_16, %c0_17] : memref<16x1xf32, #tpu.memory_space<vmem>>, vector<16x1xf32>
      %c0_18 = arith.constant 0 : index
      %c0_19 = arith.constant 0 : index
      %36 = vector.load %arg7[%c0_18, %c0_19] : memref<16x1xf32, #tpu.memory_space<vmem>>, vector<16x1xf32>
      %37 = vector.broadcast %34 : f32 to vector<16x1xf32>
      %38 = arith.mulf %37, %36 : vector<16x1xf32>
      %39 = arith.mulf %38, %32 : vector<16x1xf32>
      %40 = arith.addf %35, %39 : vector<16x1xf32>
      %c0_20 = arith.constant 0 : index
      %c0_21 = arith.constant 0 : index
      %41 = vector.load %arg9[%c0_20, %c0_21] : memref<16x1xf32, #tpu.memory_space<vmem>>, vector<16x1xf32>
      tpu.vector_store %arg9[%c0_20, %c0_21], %40 {strides = array<i32>} : memref<16x1xf32, #tpu.memory_space<vmem>>, vector<16x1xf32>,
    } else {
    }
    return
  }
  func.func @transform_0(%arg0: i32, %arg1: i32) -> i32 {
    %c0_i32 = arith.constant 0 : i32
    %c0_i32_0 = arith.constant 0 : i32
    return %c0_i32 : i32
  }
  func.func @transform_1(%arg0: i32, %arg1: i32) -> (i32, i32) {
    %c0_i32 = arith.constant 0 : i32
    %c0_i32_0 = arith.constant 0 : i32
    return %arg0, %c0_i32 : i32, i32
  }
  func.func @transform_2(%arg0: i32, %arg1: i32) -> (i32, i32) {
    %c0_i32 = arith.constant 0 : i32
    %c0_i32_0 = arith.constant 0 : i32
    return %arg1, %c0_i32 : i32, i32
  }
  func.func @transform_3(%arg0: i32, %arg1: i32) -> (i32, i32) {
    %c0_i32 = arith.constant 0 : i32
    %c0_i32_0 = arith.constant 0 : i32
    return %arg0, %c0_i32 : i32, i32
  }
  func.func @transform_4(%arg0: i32, %arg1: i32) -> (i32, i32) {
    %c0_i32 = arith.constant 0 : i32
    %c0_i32_0 = arith.constant 0 : i32
    return %c0_i32, %arg1 : i32, i32
  }
  func.func @transform_5(%arg0: i32, %arg1: i32) -> (i32, i32) {
    %c0_i32 = arith.constant 0 : i32
    %c0_i32_0 = arith.constant 0 : i32
    return %arg0, %c0_i32 : i32, i32
  }
  func.func @transform_6(%arg0: i32, %arg1: i32) -> (i32, i32) {
    %c0_i32 = arith.constant 0 : i32
    %c0_i32_0 = arith.constant 0 : i32
    return %arg1, %c0_i32 : i32, i32
  }
  func.func @transform_7(%arg0: i32, %arg1: i32) -> (i32, i32) {
    %c0_i32 = arith.constant 0 : i32
    %c0_i32_0 = arith.constant 0 : i32
    return %arg0, %c0_i32 : i32, i32
  }
}

</mosaic_0001>

<bundles_post_ra>
// kernel: tpu_custom_call.1
= control target key start
LH: loop header
LB: loop body
LE: loop exit
PB: predicated region body
PF: predicated region fallthrough
CT: control target
= control target key end

     0   :  { %12 = vsyncpa [#allocation3], 0  ;;  %s225_s27 = smov [#allocation2]   ;;  %s326_s0 = inlined_call_operand.vmem [shape: f32[5], index: 0, kind: input, shape index: {}]   ;;  %s327_s1 = inlined_call_operand.vmem [shape: f32[16,32], index: 1, kind: input, shape index: {}]   ;;  %s328_s2 = inlined_call_operand.vmem [shape: f32[16,32], index: 2, kind: input, shape index: {}]   ;;  %s329_s3 = inlined_call_operand.vmem [shape: f32[16,1], index: 3, kind: input, shape index: {}]   ;;  %s330_s4 = inlined_call_operand.vmem [shape: f32[1,16], index: 4, kind: input, shape index: {}]   ;;  %s331_s5 = inlined_call_operand.vmem [shape: f32[16,1], index: 5, kind: input, shape index: {}]   ;;  %s332_s6 = inlined_call_operand.vmem [shape: f32[16,1], index: 6, kind: input, shape index: {}]   ;;  %s333_s7 = inlined_call_operand.vmem [shape: f32[16,1], index: 7, kind: output, shape index: {}]  }
   0x1   :  { %s18_s26 = sshll.u32 %s326_s0, 4  ;;  %s19_s26 = int_to_ptr.vmem [resolvable:$true] %s18_s26 }
   0x2   :  { %21 = dma.vmem_to_smem %s19_s26, 16, %s225_s27, [#allocation3]  }
   0x3   :  { %223 = dma.done.wait [#allocation3], 16  }
   0x4   :  { %224 = vsyncadd [#allocation3], 4294967280 }
   0x5   :  { %38 = sfence }
   0x6   :  { %v53_v0 = vld [vmem:[%s328_s2 + $0x8] sm:$0xff]  ;;  %vm54_vm0 = vcmask 261120   ;;  %v52_v2 = vld [vmem:[%s328_s2] sm:$0xff]  ;;  %v226_v3 = vmov 0   ;;  %vm43_vm1 = vcmask 7168   ;;  %v227_v16 = vmov 0.0  }
   0x7   :  { %198 = vmatpush.xpose.msk.msra.mxu2 %vm54_vm0, %v53_v0  ;;  %191 = vmatpush.xpose.msk.msra.mxu0 %vm54_vm0, %v53_v0  ;;  %v91_v1 = vld [vmem:[%s329_s3 + $0x8] sm:$0xff]  ;;  %v50_v5 = vld [vmem:[%s327_s1] sm:$0xff]  ;;  %44 = vst.msk [vmem:[%s333_s7] sm:$0xff] %vm43_vm1, %v227_v16  ;;  %vm140_vm2 = vcmask 130048  }
   0x8   :  { %205 = vset.pattern.permute.xlu0 %v226_v3  ;;  %v51_v4 = vld [vmem:[%s327_s1 + $0x8] sm:$0xff]  ;;  %v90_v6 = vld [vmem:[%s329_s3] sm:$0xff]  ;;  %s195_s3 = sld [smem:[#allocation2 + $0x4]]  ;;  %45 = vst.msk [vmem:[%s333_s7 + $0x8] sm:$0xff] %vm43_vm1, %v227_v16 }
   0x9   :  { %100 = vperm.xlu0 %205, %v91_v1   ;;  %v139_v7 = vld [vmem:[%s332_s6 + $0x8] sm:$0xff]  ;;  %v138_v8 = vld [vmem:[%s332_s6] sm:$0xff] }
   0xa   :  { %161 = vmatpush.msra.mxu1 %v139_v7  ;;  %200 = vmatpush.msra.mxu3 %v139_v7  ;;  %v206_v10 = vld [vmem:[%s330_s4] ss:$0 sm:$0xff]  ;;  %v175_v51 = vld [vmem:[%s331_s5 + $0x8] sm:$0xff] }
   0xb   :  { %199 = vmatpush.xpose.msk.msra.mxu2 %vm54_vm0, %v52_v2  ;;  %192 = vmatpush.xpose.msk.msra.mxu0 %vm54_vm0, %v52_v2  ;;  %v174_v46 = vld [vmem:[%s331_s5] sm:$0xff] }
   0xc   :  { %162 = vmatpush.msra.mxu1 %v138_v8  ;;  %201 = vmatpush.msra.mxu3 %v138_v8 }
   0xe   :  { %194 = vmatmul.msk.f32.vlgmr.msra.gmra.mxu2 %vm54_vm0, %v51_v4  ;;  %193 = vmatmul.msk.f32.vlgmr.msra.gmra.mxu0 %vm54_vm0, %v50_v5  ;;  %v115_v17 = vstv %s195_s3  ;;  %v172_v48 = vld [vmem:[%s333_s7] sm:$0xff] }
   0xf   :  { %v173_v53 = vld [vmem:[%s333_s7 + $0x8] sm:$0xff] }
  0x11   :  { %95 = vperm.xlu0 %205, %v90_v6  }
  0x7b   :  { %v101_v9 = vpop.permute.xlu0 %100 }
  0x7c   :  { %v107_v20 = vadd.f32 %v206_v10, %v101_v9 }
  0x83   :  { %v96_v11 = vpop.permute.xlu0 %95 }
  0x84   :  { %v106_v12 = vadd.f32 %v206_v10, %v96_v11 }
  0x8b   :  { %v84_v13 = vpop.f32.mrf.mxu0 }
  0x8c   :  { %v108_v14 = vmul.f32 2.0, %v84_v13 }
  0x8e   :  { %v110_v15 = vsub.f32 %v106_v12, %v108_v14 }
  0x90   :  { %v112_v18 = vmax.f32 %v110_v15, 0.0 }
  0x91   :  { %v87_v19 = vpop.f32.mrf.mxu2 }
  0x92   :  { %v116_v21 = vmul.f32 %v115_v17, %v112_v18  ;;  %v109_v22 = vmul.f32 2.0, %v87_v19 }
  0x94   :  { %v118_v23 = vmul.f32 1.442695, %v116_v21  ;;  %v111_v24 = vsub.f32 %v107_v20, %v109_v22 }
  0x96   :  { %207 = vpow2.f32 %v118_v23  ;;  %v113_v25 = vmax.f32 %v111_v24, 0.0 }
  0x98   :  { %v117_v26 = vmul.f32 %v115_v17, %v113_v25 }
  0x9a   :  { %v120_v27 = vmul.f32 1.442695, %v117_v26 }
  0x9c   :  { %v208_v28 = vpop.eup %207  ;;  %209 = vpow2.f32 %v120_v27 }
  0x9d   :  { %v122_v29 = vmul.f32 %v208_v28, %v208_v28 }
  0x9f   :  { %v124_v30 = vadd.f32 %v208_v28, %v122_v29  ;;  %v126_v31 = vmul.f32 %v122_v29, %v122_v29 }
  0xa1   :  { %v128_v32 = vadd.f32 %v126_v31, %v124_v30  ;;  %v130_v33 = vmul.f32 %v126_v31, %v126_v31 }
  0xa2   :  { %v210_v34 = vpop.eup %209 }
  0xa3   :  { %v132_v35 = vadd.f32 %v130_v33, %v128_v32  ;;  %v134_v36 = vmul.f32 %v130_v33, %v130_v33  ;;  %v123_v37 = vmul.f32 %v210_v34, %v210_v34 }
  0xa5   :  { %v136_v38 = vadd.f32 %v134_v36, %v132_v35  ;;  %v125_v39 = vadd.f32 %v210_v34, %v123_v37  ;;  %v127_v40 = vmul.f32 %v123_v37, %v123_v37 }
  0xa7   :  { %196 = vmatmul.msk.f32.vlgmr.msra.gmra.mxu1 %vm140_vm2, %v136_v38  ;;  %v129_v41 = vadd.f32 %v127_v40, %v125_v39  ;;  %v131_v42 = vmul.f32 %v127_v40, %v127_v40 }
  0xa9   :  { %v133_v43 = vadd.f32 %v131_v42, %v129_v41  ;;  %v135_v44 = vmul.f32 %v131_v42, %v131_v42 }
  0xab   :  { %v137_v45 = vadd.f32 %v135_v44, %v133_v43 }
  0xad   :  { %197 = vmatmul.msk.f32.vlgmr.msra.gmra.mxu3 %vm140_vm2, %v137_v45 }
 0x124   :  { %v164_v47 = vpop.f32.mrf.mxu1 }
 0x125   :  { %v179_v49 = vmul.f32 %v174_v46, %v164_v47 }
 0x127   :  { %v181_v50 = vadd.f32 %v179_v49, %v172_v48 }
 0x129   :  { %184 = vst.msk [vmem:[%s333_s7] sm:$0xff] %vm43_vm1, %v181_v50 }
 0x130   :  { %v167_v52 = vpop.f32.mrf.mxu3 }
 0x131   :  { %v180_v54 = vmul.f32 %v175_v51, %v167_v52 }
 0x133   :  { %v182_v55 = vadd.f32 %v180_v54, %v173_v53 }
 0x135   :  { %185 = vst.msk [vmem:[%s333_s7 + $0x8] sm:$0xff] %vm43_vm1, %v182_v55 }
 0x136   :  { %190 = vsyncpa [#allocation3], 1 }

</bundles_post_ra>
